<compile_context>
chip_gen: v7x
topology: tpu7x:2x2x1
jax: 0.10.0
libtpu: 0.0.40
codegen_flags: <defaults>
</compile_context>

<pallas_src>
import numpy as np
import jax
import jax.numpy as jnp
from jax.experimental import pallas as pl
from jax.experimental.pallas import tpu as pltpu


def retention_kernel(x_ref, w_ref, b_ref, decay_ref, dpow_ref, o_ref, mem_sc):
    # x_ref:     (b_tile, t_chunk, D)  input block, native (B, T, D) layout
    # w_ref:     (D, 3D) bf16          fused [Wq.T | Wk.T | Wv.T]
    # b_ref:     (1, 3D) f32           fused biases
    # decay_ref: (1, D)  f32           per-channel decay
    # dpow_ref:  (t_chunk, D) f32      decay^(t+1) for t in [0, t_chunk)
    # o_ref:     (b_tile, t_chunk, D)  output block
    # mem_sc:    (b_tile, D) f32       recurrent carry, persists across time chunks
    bt, tc, d = x_ref.shape

    # Reset the carry at the first time chunk of each batch tile.
    @pl.when(pl.program_id(1) == 0)
    def _():
        mem_sc[...] = jnp.zeros_like(mem_sc)

    # ---- fused QKV projection on the MXU (bf16 operands, f32 accumulation) ----
    # Time-major reorder so the scan shifts below are free leading-axis slices.
    xt = pltpu.einshape("btd->tbd", x_ref[...])                      # (tc, bt, d)
    x2 = xt.reshape(tc * bt, d).astype(jnp.bfloat16)
    qkv = jnp.dot(x2, w_ref[...], preferred_element_type=jnp.float32) + b_ref[...]
    q = qkv[:, :d].reshape(tc, bt, d)                                # f32
    kv = (qkv[:, d:2 * d] * qkv[:, 2 * d:]).reshape(tc, bt, d)       # k*v, f32

    # ---- log-depth inclusive scan:  kv[t] <- sum_{s<=t} decay^(t-s) * kv[s] ----
    # Hillis-Steele: at level k the multiplier is decay^(2^k) for every position.
    d_pow = decay_ref[...].astype(jnp.float32).reshape(1, 1, d)
    shift = 1
    while shift < tc:                       # static Python loop, ~log2(tc) levels
        pad = jnp.zeros((shift, bt, d), jnp.float32)
        shifted = jnp.concatenate([pad, kv[: tc - shift]], axis=0)
        kv = kv + d_pow * shifted
        d_pow = d_pow * d_pow
        shift *= 2

    # ---- fold in the cross-chunk carry and form the output in one pass ----
    carry = mem_sc[...].reshape(1, bt, d)
    dpows = dpow_ref[...].reshape(tc, 1, d)          # decay^(t+1)
    mem = kv + dpows * carry                         # mem_t for every t in the chunk
    mem_sc[...] = mem[tc - 1]                        # new carry
    out = q * mem
    o_ref[...] = pltpu.einshape("tbd->btd", out).astype(o_ref.dtype)


def _pick_tile(n, cap, align=1):
    """Largest divisor of n that is <= cap and (a multiple of `align` or == n)."""
    for cand in range(min(n, cap), 0, -1):
        if n % cand == 0 and (cand == n or cand % align == 0):
            return cand
    return n


def _batch_tile(B, cap=32):
    """Pad B up to a multiple of 8 and pick an 8-aligned tile <= cap dividing it."""
    b_pad = ((B + 7) // 8) * 8
    b_tile = 8
    for cand in range(cap, 7, -8):
        if b_pad % cand == 0:
            b_tile = cand
            break
    return b_pad, b_tile


def retention_forward(x, wq, bq, wk, bk, wv, bv, decay):
    """x: (B, T, D).  wq/wk/wv: (D, D) as in nn.Linear (out, in).  decay: (1,1,D)."""
    B, T, D = x.shape

    # One-time parameter fusion (tiny, done by XLA outside the kernel).
    w_qkv = jnp.concatenate([wq.T, wk.T, wv.T], axis=1).astype(jnp.bfloat16)  # (D, 3D)
    b_qkv = jnp.concatenate([bq, bk, bv]).reshape(1, 3 * D).astype(jnp.float32)
    decay2 = decay.reshape(1, D).astype(jnp.float32)                          # (1, D)

    # Tiling: 8-aligned batch tile (sublane-full vregs), time chunk bounded by a
    # ~4 MiB f32 slab budget so temporaries + double-buffered blocks fit v7x (64 MiB).
    b_pad, b_tile = _batch_tile(B, cap=32)
    slab_elems_budget = (4 * 1024 * 1024) // 4
    cap_t = min(256, max(8, (slab_elems_budget // (b_tile * D)) // 8 * 8))
    t_chunk = _pick_tile(T, cap_t, align=8)

    # decay^(t+1) for the chunk-local closed form: mem_t = decay^(t+1)*carry + B_t.
    decay_pows = decay2 ** jnp.arange(1, t_chunk + 1, dtype=jnp.float32)[:, None]

    if b_pad != B:
        x = jnp.pad(x, ((0, b_pad - B), (0, 0), (0, 0)))

    grid = (b_pad // b_tile, T // t_chunk)

    out = pl.pallas_call(
        retention_kernel,
        out_shape=jax.ShapeDtypeStruct((b_pad, T, D), x.dtype),
        grid=grid,
        in_specs=[
            pl.BlockSpec((b_tile, t_chunk, D), lambda b, t: (b, t, 0)),   # x
            pl.BlockSpec((D, 3 * D), lambda b, t: (0, 0)),                # W_qkv (bf16)
            pl.BlockSpec((1, 3 * D), lambda b, t: (0, 0)),                # b_qkv
            pl.BlockSpec((1, D), lambda b, t: (0, 0)),                    # decay
            pl.BlockSpec((t_chunk, D), lambda b, t: (0, 0)),              # decay^(t+1)
        ],
        out_specs=pl.BlockSpec((b_tile, t_chunk, D), lambda b, t: (b, t, 0)),
        scratch_shapes=[
            pltpu.VMEM((b_tile, D), jnp.float32),      # recurrent carry
        ],
        compiler_params=pltpu.CompilerParams(
            dimension_semantics=("parallel", "arbitrary"),
            vmem_limit_bytes=48 * 1024 * 1024,
        ),
    )(x, w_qkv, b_qkv, decay2, decay_pows)

    if b_pad != B:
        out = out[:B]
    return out


def retention_reference(x, wq, bq, wk, bk, wv, bv, decay, mxu_dtype=None):
    """Pure-JAX reference matching the PyTorch loop.

    mxu_dtype=jnp.bfloat16 mimics the kernel's bf16-operand / f32-accumulate matmul.
    """
    B, T, D = x.shape

    def proj(w, b):
        if mxu_dtype is None:
            return x @ w.T + b
        return jnp.dot(x.astype(mxu_dtype), w.T.astype(mxu_dtype),
                       preferred_element_type=jnp.float32) + b

    q = proj(wq, bq)
    k = proj(wk, bk)
    v = proj(wv, bv)
    d = decay.reshape(1, D)
    mem = jnp.zeros((B, D), jnp.float32)
    outs = []
    for t in range(T):
        mem = d * mem + k[:, t] * v[:, t]
        outs.append(q[:, t] * mem)
    return jnp.stack(outs, axis=1)


if __name__ == "__main__":
    B, T, D = 2, 8, 128
    retention_size = 4  # unused in forward (matches the PyTorch module)

    key = jax.random.PRNGKey(0)
    kx, kwq, kbq, kwk, kbk, kwv, kbv = jax.random.split(key, 7)

    x = jax.random.normal(kx, (B, T, D), dtype=jnp.float32)

    # nn.Linear default init: U(-1/sqrt(in), 1/sqrt(in)) for weight and bias.
    bound = 1.0 / np.sqrt(D)
    wq = jax.random.uniform(kwq, (D, D), jnp.float32, -bound, bound)
    bq = jax.random.uniform(kbq, (D,), jnp.float32, -bound, bound)
    wk = jax.random.uniform(kwk, (D, D), jnp.float32, -bound, bound)
    bk = jax.random.uniform(kbk, (D,), jnp.float32, -bound, bound)
    wv = jax.random.uniform(kwv, (D, D), jnp.float32, -bound, bound)
    bv = jax.random.uniform(kbv, (D,), jnp.float32, -bound, bound)
    decay = jnp.ones((1, 1, D), jnp.float32) * 0.9

    out = retention_forward(x, wq, bq, wk, bk, wv, bv, decay)
    out = jax.block_until_ready(out)
    out_np = np.asarray(out)

    # Tight structural check against a reference that uses the same bf16-operand
    # MXU projection (recurrence/accumulation in f32 in both).
    ref_bf16 = np.asarray(
        retention_reference(x, wq, bq, wk, bk, wv, bv, decay, mxu_dtype=jnp.bfloat16))
    if not np.allclose(out_np, ref_bf16, atol=1e-3, rtol=1e-3):
        err = float(np.max(np.abs(out_np - ref_bf16)))
        raise AssertionError(f"kernel != bf16-MXU reference (max |err|={err})")

    # Looser fidelity check against the exact f32 PyTorch-semantics reference
    # (difference is only the intentional bf16 quantization of the projection).
    ref_f32 = np.asarray(retention_reference(x, wq, bq, wk, bk, wv, bv, decay))
    if not np.allclose(out_np, ref_f32, atol=1e-1, rtol=1e-1):
        err = float(np.max(np.abs(out_np - ref_f32)))
        raise AssertionError(f"kernel != f32 reference (max |err|={err})")

    print("KERNEL_OK")
</pallas_src>

<mosaic_0001>
module attributes {stable_mosaic.version = 11 : i64} {
  func.func @retention_kernel(%arg0: i32, %arg1: i32, %arg2: memref<8x8x128xf32, #tpu.memory_space<vmem>>, %arg3: memref<128x384xbf16, #tpu.memory_space<vmem>>, %arg4: memref<1x384xf32, #tpu.memory_space<vmem>>, %arg5: memref<1x128xf32, #tpu.memory_space<vmem>>, %arg6: memref<8x128xf32, #tpu.memory_space<vmem>>, %arg7: memref<8x8x128xf32, #tpu.memory_space<vmem>>, %arg8: memref<8x128xf32, #tpu.memory_space<vmem>>) attributes {dimension_semantics = [#tpu.dimension_semantics<parallel>, #tpu.dimension_semantics<arbitrary>], iteration_bounds = array<i64: 1, 1>, scalar_prefetch = 0 : i64, scratch_operands = 1 : i64, tpu.core_type = #tpu.core_type<tc>, window_params = [{transform_indices = @transform_0, window_bounds = array<i64: 8, 8, 128>}, {pipeline_mode = #tpu.pipeline_mode<synchronous>, transform_indices = @transform_1, window_bounds = array<i64: 128, 384>}, {pipeline_mode = #tpu.pipeline_mode<synchronous>, transform_indices = @transform_2, window_bounds = array<i64: 1, 384>}, {pipeline_mode = #tpu.pipeline_mode<synchronous>, transform_indices = @transform_3, window_bounds = array<i64: 1, 128>}, {pipeline_mode = #tpu.pipeline_mode<synchronous>, transform_indices = @transform_4, window_bounds = array<i64: 8, 128>}, {transform_indices = @transform_5, window_bounds = array<i64: 8, 8, 128>}]} {
    %c0_i32 = arith.constant 0 : i32
    %0 = arith.cmpi eq, %arg1, %c0_i32 : i32
    %1 = arith.extui %0 : i1 to i32
    %c0_i32_0 = arith.constant 0 : i32
    %2 = arith.cmpi ne, %1, %c0_i32_0 : i32
    scf.if %2 {
      %cst_21 = arith.constant 0.000000e+00 : f32
      %54 = vector.broadcast %cst_21 : f32 to vector<8x128xf32>
      %c0_22 = arith.constant 0 : index
      %c0_23 = arith.constant 0 : index
      %55 = vector.load %arg8[%c0_22, %c0_23] : memref<8x128xf32, #tpu.memory_space<vmem>>, vector<8x128xf32>
      tpu.vector_store %arg8[%c0_22, %c0_23], %54 {strides = array<i32>} : memref<8x128xf32, #tpu.memory_space<vmem>>, vector<8x128xf32>,
    } else {
    }
    %c0 = arith.constant 0 : index
    %c0_1 = arith.constant 0 : index
    %c0_2 = arith.constant 0 : index
    %3 = vector.load %arg2[%c0, %c0_1, %c0_2] : memref<8x8x128xf32, #tpu.memory_space<vmem>>, vector<8x8x128xf32>
    %4 = tpu.transpose %3, [1, 0, 2] : vector<8x8x128xf32> -> vector<8x8x128xf32>
    %5 = vector.shape_cast %4 : vector<8x8x128xf32> to vector<64x128xf32>
    %6 = arith.truncf %5 : vector<64x128xf32> to vector<64x128xbf16>
    %c0_3 = arith.constant 0 : index
    %c0_4 = arith.constant 0 : index
    %7 = vector.load %arg3[%c0_3, %c0_4] : memref<128x384xbf16, #tpu.memory_space<vmem>>, vector<128x384xbf16>
    %cst = arith.constant dense<0.000000e+00> : vector<64x384xf32>
    %8 = tpu.matmul %6, %7, %cst {dimension_numbers = #tpu.dot_dimension_numbers<[1], [0], [0], [1], [0, 0, 1, 1], [], []>} : vector<64x128xbf16>, vector<128x384xbf16>, vector<64x384xf32> -> vector<64x384xf32>
    %c0_5 = arith.constant 0 : index
    %c0_6 = arith.constant 0 : index
    %9 = vector.load %arg4[%c0_5, %c0_6] : memref<1x384xf32, #tpu.memory_space<vmem>>, vector<1x384xf32>
    %10 = vector.broadcast %9 : vector<1x384xf32> to vector<64x384xf32>
    %11 = arith.addf %8, %10 : vector<64x384xf32>
    %12 = vector.extract_strided_slice %11 {offsets = [0, 0], sizes = [64, 128], strides = [1, 1]} : vector<64x384xf32> to vector<64x128xf32>
    %13 = vector.shape_cast %12 : vector<64x128xf32> to vector<8x8x128xf32>
    %14 = vector.extract_strided_slice %11 {offsets = [0, 128], sizes = [64, 128], strides = [1, 1]} : vector<64x384xf32> to vector<64x128xf32>
    %15 = vector.extract_strided_slice %11 {offsets = [0, 256], sizes = [64, 128], strides = [1, 1]} : vector<64x384xf32> to vector<64x128xf32>
    %16 = arith.mulf %14, %15 : vector<64x128xf32>
    %17 = vector.shape_cast %16 : vector<64x128xf32> to vector<8x8x128xf32>
    %c0_7 = arith.constant 0 : index
    %c0_8 = arith.constant 0 : index
    %18 = vector.load %arg5[%c0_7, %c0_8] : memref<1x128xf32, #tpu.memory_space<vmem>>, vector<1x128xf32>
    %19 = vector.shape_cast %18 : vector<1x128xf32> to vector<1x1x128xf32>
    %cst_9 = arith.constant 0.000000e+00 : f32
    %20 = vector.broadcast %cst_9 : f32 to vector<1x8x128xf32>
    %21 = vector.extract_strided_slice %17 {offsets = [0, 0, 0], sizes = [7, 8, 128], strides = [1, 1, 1]} : vector<8x8x128xf32> to vector<7x8x128xf32>
    %22 = tpu.concatenate %20, %21 in 0 : vector<1x8x128xf32>, vector<7x8x128xf32> -> vector<8x8x128xf32>
    %23 = vector.broadcast %19 : vector<1x1x128xf32> to vector<8x8x128xf32>
    %24 = arith.mulf %23, %22 : vector<8x8x128xf32>
    %25 = arith.addf %17, %24 : vector<8x8x128xf32>
    %26 = arith.mulf %19, %19 : vector<1x1x128xf32>
    %cst_10 = arith.constant 0.000000e+00 : f32
    %27 = vector.broadcast %cst_10 : f32 to vector<2x8x128xf32>
    %28 = vector.extract_strided_slice %25 {offsets = [0, 0, 0], sizes = [6, 8, 128], strides = [1, 1, 1]} : vector<8x8x128xf32> to vector<6x8x128xf32>
    %29 = tpu.concatenate %27, %28 in 0 : vector<2x8x128xf32>, vector<6x8x128xf32> -> vector<8x8x128xf32>
    %30 = vector.broadcast %26 : vector<1x1x128xf32> to vector<8x8x128xf32>
    %31 = arith.mulf %30, %29 : vector<8x8x128xf32>
    %32 = arith.addf %25, %31 : vector<8x8x128xf32>
    %33 = arith.mulf %26, %26 : vector<1x1x128xf32>
    %cst_11 = arith.constant 0.000000e+00 : f32
    %34 = vector.broadcast %cst_11 : f32 to vector<4x8x128xf32>
    %35 = vector.extract_strided_slice %32 {offsets = [0, 0, 0], sizes = [4, 8, 128], strides = [1, 1, 1]} : vector<8x8x128xf32> to vector<4x8x128xf32>
    %36 = tpu.concatenate %34, %35 in 0 : vector<4x8x128xf32>, vector<4x8x128xf32> -> vector<8x8x128xf32>
    %37 = vector.broadcast %33 : vector<1x1x128xf32> to vector<8x8x128xf32>
    %38 = arith.mulf %37, %36 : vector<8x8x128xf32>
    %39 = arith.addf %32, %38 : vector<8x8x128xf32>
    %c0_12 = arith.constant 0 : index
    %c0_13 = arith.constant 0 : index
    %40 = vector.load %arg8[%c0_12, %c0_13] : memref<8x128xf32, #tpu.memory_space<vmem>>, vector<8x128xf32>
    %41 = vector.shape_cast %40 : vector<8x128xf32> to vector<1x8x128xf32>
    %c0_14 = arith.constant 0 : index
    %c0_15 = arith.constant 0 : index
    %42 = vector.load %arg6[%c0_14, %c0_15] : memref<8x128xf32, #tpu.memory_space<vmem>>, vector<8x128xf32>
    %43 = vector.shape_cast %42 : vector<8x128xf32> to vector<8x1x128xf32>
    %44 = vector.broadcast %43 : vector<8x1x128xf32> to vector<8x8x128xf32>
    %45 = vector.broadcast %41 : vector<1x8x128xf32> to vector<8x8x128xf32>
    %46 = arith.mulf %44, %45 : vector<8x8x128xf32>
    %47 = arith.addf %39, %46 : vector<8x8x128xf32>
    %48 = vector.extract_strided_slice %47 {offsets = [7, 0, 0], sizes = [1, 8, 128], strides = [1, 1, 1]} : vector<8x8x128xf32> to vector<1x8x128xf32>
    %49 = vector.shape_cast %48 : vector<1x8x128xf32> to vector<8x128xf32>
    %c0_16 = arith.constant 0 : index
    %c0_17 = arith.constant 0 : index
    %50 = vector.load %arg8[%c0_16, %c0_17] : memref<8x128xf32, #tpu.memory_space<vmem>>, vector<8x128xf32>
    tpu.vector_store %arg8[%c0_16, %c0_17], %49 {strides = array<i32>} : memref<8x128xf32, #tpu.memory_space<vmem>>, vector<8x128xf32>,
    %51 = arith.mulf %13, %47 : vector<8x8x128xf32>
    %52 = tpu.transpose %51, [1, 0, 2] : vector<8x8x128xf32> -> vector<8x8x128xf32>
    %c0_18 = arith.constant 0 : index
    %c0_19 = arith.constant 0 : index
    %c0_20 = arith.constant 0 : index
    %53 = vector.load %arg7[%c0_18, %c0_19, %c0_20] : memref<8x8x128xf32, #tpu.memory_space<vmem>>, vector<8x8x128xf32>
    tpu.vector_store %arg7[%c0_18, %c0_19, %c0_20], %52 {strides = array<i32>} : memref<8x8x128xf32, #tpu.memory_space<vmem>>, vector<8x8x128xf32>,
    return
  }
  func.func @transform_0(%arg0: i32, %arg1: i32) -> (i32, i32, i32) {
    %c0_i32 = arith.constant 0 : i32
    %c0_i32_0 = arith.constant 0 : i32
    return %arg0, %arg1, %c0_i32 : i32, i32, i32
  }
  func.func @transform_1(%arg0: i32, %arg1: i32) -> (i32, i32) {
    %c0_i32 = arith.constant 0 : i32
    %c0_i32_0 = arith.constant 0 : i32
    %c0_i32_1 = arith.constant 0 : i32
    return %c0_i32, %c0_i32_0 : i32, i32
  }
  func.func @transform_2(%arg0: i32, %arg1: i32) -> (i32, i32) {
    %c0_i32 = arith.constant 0 : i32
    %c0_i32_0 = arith.constant 0 : i32
    %c0_i32_1 = arith.constant 0 : i32
    return %c0_i32, %c0_i32_0 : i32, i32
  }
  func.func @transform_3(%arg0: i32, %arg1: i32) -> (i32, i32) {
    %c0_i32 = arith.constant 0 : i32
    %c0_i32_0 = arith.constant 0 : i32
    %c0_i32_1 = arith.constant 0 : i32
    return %c0_i32, %c0_i32_0 : i32, i32
  }
  func.func @transform_4(%arg0: i32, %arg1: i32) -> (i32, i32) {
    %c0_i32 = arith.constant 0 : i32
    %c0_i32_0 = arith.constant 0 : i32
    %c0_i32_1 = arith.constant 0 : i32
    return %c0_i32, %c0_i32_0 : i32, i32
  }
  func.func @transform_5(%arg0: i32, %arg1: i32) -> (i32, i32, i32) {
    %c0_i32 = arith.constant 0 : i32
    %c0_i32_0 = arith.constant 0 : i32
    return %arg0, %arg1, %c0_i32 : i32, i32, i32
  }
}

</mosaic_0001>

<bundles_post_ra>
// kernel: tpu_custom_call.1
= control target key start
LH: loop header
LB: loop body
LE: loop exit
PB: predicated region body
PF: predicated region fallthrough
CT: control target
= control target key end

     0   :  { %10 = vsyncpa [#allocation4], 0  ;;  %s1287_s0 = inlined_call_operand.hbm [shape: f32[8,8,128], index: 0, kind: input, shape index: {}]   ;;  %s1288_s1 = inlined_call_operand.hbm [shape: bf16[128,384], index: 1, kind: input, shape index: {}]   ;;  %s1289_s2 = inlined_call_operand.vmem [shape: f32[1,384], index: 2, kind: input, shape index: {}]   ;;  %s1290_s3 = inlined_call_operand.vmem [shape: f32[1,128], index: 3, kind: input, shape index: {}]   ;;  %s1291_s4 = inlined_call_operand.vmem [shape: f32[8,128], index: 4, kind: input, shape index: {}]   ;;  %s1292_s5 = inlined_call_operand.hbm [shape: f32[8,8,128], index: 5, kind: output, shape index: {}]  }
   0x1   :  { %11 = vsyncpa [#allocation7], 0 }
   0x2   :  { %12 = vsyncpa [#allocation5], 0  ;;  %s1058_s18 = smov [#allocation3]   ;;  %s986_s22 = scalar_lea.hbm %s1287_s0, 1024 }
   0x3   :  { %s18_s19 = sshll.u32 %s1058_s18, 4  ;;  %p987_p0 = scmp.ne.s32.totalorder %s1287_s0, %s986_s22  ;;  %s19_s19 = int_to_ptr.vmem [resolvable:$true] %s18_s19 }
   0x4   :  { %p990_p1 = scmp.lt.u32.totalorder %s986_s22, %s1287_s0 }
   0x6   :  { %p992_p2 = pnand %p990_p1, %p987_p0 }
   0x8   :  { %995 = shalt.err (!%p992_p2)
}
   0x9   :  { %s996_s27 = scalar_lea.vmem %s19_s19, 1024  ;;  %p1001_p4 = scmp.lt.s32.totalorder %s19_s19, %s19_s19 }
   0xa   :  { %p997_p3 = scmp.ne.s32.totalorder %s19_s19, %s996_s27  ;;  %p1002_p5 = scmp.lt.s32.totalorder %s996_s27, %s996_s27 }
   0xc   :  { %p1003_p6 = por %p1002_p5, %p1001_p4 }
   0xe   :  { %p1004_p7 = pnand %p1003_p6, %p997_p3 }
  0x10   :  { %1007 = shalt.err (!%p1004_p7)
}
  0x11   :  { %s1059_s28 = smov 128   ;;  %s1060_s29 = smov 8  }
  0x12   :  { %24 = dma.hbm_to_vmem [thread:$0]  %s1287_s0, 1024, %s19_s19, [#allocation4], %s1059_s28, %s1059_s28, %s1060_s29  }
  0x13   :  { %s1061_s7 = smov [#allocation6]   ;;  %s1008_s11 = scalar_lea.hbm %s1288_s1, 3072 }
  0x14   :  { %s30_s8 = sshll.u32 %s1061_s7, 4  ;;  %p1009_p8 = scmp.ne.s32.totalorder %s1288_s1, %s1008_s11  ;;  %s31_s8 = int_to_ptr.vmem [resolvable:$true] %s30_s8 }
  0x15   :  { %p1012_p9 = scmp.lt.u32.totalorder %s1008_s11, %s1288_s1 }
  0x17   :  { %p1014_p10 = pnand %p1012_p9, %p1009_p8 }
  0x19   :  { %1017 = shalt.err (!%p1014_p10)
}
  0x1a   :  { %s1018_s16 = scalar_lea.vmem %s31_s8, 3072  ;;  %p1023_p12 = scmp.lt.s32.totalorder %s31_s8, %s31_s8 }
  0x1b   :  { %p1019_p11 = scmp.ne.s32.totalorder %s31_s8, %s1018_s16  ;;  %p1024_p13 = scmp.lt.s32.totalorder %s1018_s16, %s1018_s16 }
  0x1d   :  { %p1025_p0 = por %p1024_p13, %p1023_p12 }
  0x1f   :  { %p1026_p1 = pnand %p1025_p0, %p1019_p11 }
  0x21   :  { %1029 = shalt.err (!%p1026_p1)
}
  0x22   :  { %s1062_s0 = smov 192   ;;  %s1063_s17 = smov 12  }
  0x23   :  { %36 = dma.hbm_to_vmem [thread:$0]  %s1288_s1, 3072, %s31_s8, [#allocation7], %s1062_s0, %s1062_s0, %s1063_s17  }
  0x24   :  { %1052 = dma.done.wait [#allocation4], 1024  }
  0x25   :  { %1053 = vsyncadd [#allocation4], 4294966272 }
  0x26   :  { %1054 = dma.done.wait [#allocation7], 3072  }
  0x27   :  { %1055 = vsyncadd [#allocation7], 4294964224  ;;  %v1064_v0 = vmov 0   ;;  %v941_v1 = vld [vmem:[#allocation6 + $0x4] ss:$12 sps:$4 sm:$0xff]   ;;  %v68_v12 = vlaneseq }
  0x28   :  { %412 = vmatprep.mubr.bf16.mxu0 %v1064_v0  ;;  %v943_v2 = vld [vmem:[#allocation6 + $0x8] ss:$12 sps:$4 sm:$0xff]   ;;  %380 = vmatprep.subr.bf16.mxu0 %v941_v1  ;;  %v944_v3 = vld [vmem:[#allocation6] ss:$12 sps:$4 sm:$0xff]   ;;  %v948_v6 = vld [vmem:[#allocation6 + $0x18] ss:$12 sps:$4 sm:$0xff]  }
  0x29   :  { %906 = vmatprep.subr.bf16.mxu1 %v943_v2  ;;  %v945_v4 = vld [vmem:[#allocation6 + $0x1c] ss:$12 sps:$4 sm:$0xff]   ;;  %381 = vmatpush1.bf16.msra.mxu0 %v944_v3  ;;  %v947_v5 = vld [vmem:[#allocation6 + $0x20] ss:$12 sps:$4 sm:$0xff]   ;;  %v951_v8 = vld [vmem:[#allocation6 + $0x38] ss:$12 sps:$4 sm:$0xff]  }
  0x2a   :  { %907 = vmatpush3.bf16.msra.mxu1 %v943_v2  ;;  %382 = vmatprep.subr.bf16.mxu0 %v945_v4  ;;  %v949_v7 = vld [vmem:[#allocation6 + $0x34] ss:$12 sps:$4 sm:$0xff]   ;;  %v952_v9 = vld [vmem:[#allocation6 + $0x30] ss:$12 sps:$4 sm:$0xff]   ;;  %v953_v10 = vld [vmem:[#allocation6 + $0x4c] ss:$12 sps:$4 sm:$0xff]  }
  0x2b   :  { %908 = vmatprep.subr.bf16.mxu1 %v947_v5  ;;  %v955_v11 = vld [vmem:[#allocation6 + $0x50] ss:$12 sps:$4 sm:$0xff]   ;;  %v1065_v13 = vmov 1983009808   ;;  %v956_v15 = vld [vmem:[#allocation6 + $0x48] ss:$12 sps:$4 sm:$0xff]  }
  0x2c   :  { %v66_v14 = vunpack.c.l.s4 %v1065_v13  ;;  %v957_v16 = vld [vmem:[#allocation6 + $0x64] ss:$12 sps:$4 sm:$0xff]   ;;  %v959_v17 = vld [vmem:[#allocation6 + $0x68] ss:$12 sps:$4 sm:$0xff]   ;;  %v1127_v18 = vshrl.u32 %v68_v12, 7 }
  0x2d   :  { %383 = vmatpush1.bf16.msra.mxu0 %v948_v6  ;;  %v960_v19 = vld [vmem:[#allocation6 + $0x60] ss:$12 sps:$4 sm:$0xff]   ;;  %v1066_v21 = vmov 1934713408   ;;  %v961_v23 = vld [vmem:[#allocation6 + $0x7c] ss:$12 sps:$4 sm:$0xff]  }
  0x2e   :  { %909 = vmatpush3.bf16.msra.mxu1 %v947_v5  ;;  %384 = vmatprep.subr.bf16.mxu0 %v949_v7  ;;  %v67_v20 = vunpack.c.0.s8 %v66_v14  ;;  %v130_v22 = vunpack.c.l.s4 %v1066_v21  ;;  %v963_v24 = vld [vmem:[#allocation6 + $0x80] ss:$12 sps:$4 sm:$0xff]   ;;  %v964_v25 = vld [vmem:[#allocation6 + $0x78] ss:$12 sps:$4 sm:$0xff]   ;;  %v968_v41 = vld [vmem:[#allocation6 + $0x90] ss:$12 sps:$4 sm:$0xff]  }
  0x2f   :  { %910 = vmatprep.subr.bf16.mxu1 %v951_v8  ;;  %v965_v26 = vld [vmem:[#allocation6 + $0x94] ss:$12 sps:$4 sm:$0xff]   ;;  %v967_v27 = vld [vmem:[#allocation6 + $0x98] ss:$12 sps:$4 sm:$0xff]   ;;  %v978_v33 = vld [vmem:[#allocation3 + $0xc] ss:$16 sps:$4 sm:$0xff]  }
  0x30   :  { %v1130_v28 = vsub.s32 %v67_v20, %v1127_v18  ;;  %v131_v29 = vunpack.c.0.s8 %v130_v22  ;;  %v973_v30 = vld [vmem:[#allocation3] ss:$16 sps:$4 sm:$0xff]   ;;  %v975_v31 = vld [vmem:[#allocation3 + $0x4] ss:$16 sps:$4 sm:$0xff]   ;;  %v976_v32 = vld [vmem:[#allocation3 + $0x8] ss:$16 sps:$4 sm:$0xff]  }
  0x31   :  { %385 = vmatpush1.bf16.msra.mxu0 %v952_v9  ;;  %v979_v34 = vld [vmem:[#allocation3 + $0x20] ss:$16 sps:$4 sm:$0xff]   ;;  %v981_v36 = vld [vmem:[#allocation3 + $0x24] ss:$16 sps:$4 sm:$0xff]   ;;  %v982_v37 = vld [vmem:[#allocation3 + $0x28] ss:$16 sps:$4 sm:$0xff]  }
  0x32   :  { %911 = vmatpush3.bf16.msra.mxu1 %v951_v8  ;;  %386 = vmatprep.subr.bf16.mxu0 %v953_v10  ;;  %v71_v35 = vrot.slane %v973_v30, %v1130_v28  ;;  %v984_v38 = vld [vmem:[#allocation3 + $0x2c] ss:$16 sps:$4 sm:$0xff]   ;;  %v1134_v39 = vsub.s32 %v131_v29, %v1127_v18  ;;  %v78_v40 = vrot.slane %v975_v31, %v1130_v28  ;;  %v972_v58 = vld [vmem:[#allocation6 + $0xa8] ss:$12 sps:$4 sm:$0xff]   ;;  %v526_v21 = vld [vmem:[%s1290_s3] sm:$0x1] }
  0x33   :  { %912 = vmatprep.subr.bf16.mxu1 %v955_v11  ;;  %v87_v42 = vrot.slane %v976_v32, %v1130_v28  ;;  %v103_v43 = vrot.slane %v979_v34, %v1130_v28  ;;  %v94_v44 = vrot.slane %v978_v33, %v1130_v28  ;;  %v969_v45 = vld [vmem:[#allocation6 + $0xac] ss:$12 sps:$4 sm:$0xff]   ;;  %v971_v46 = vld [vmem:[#allocation6 + $0xb0] ss:$12 sps:$4 sm:$0xff]   ;;  %v119_v47 = vrot.slane %v982_v37, %v1130_v28  ;;  %v592_v22 = vld [vmem:[%s1291_s4] sm:$0xff] }
  0x34   :  { %v110_v48 = vrot.slane %v981_v36, %v1130_v28  ;;  %v126_v49 = vrot.slane %v984_v38, %v1130_v28  ;;  %v594_v29 = vcombine.high %v592_v22, %v592_v22 }
  0x35   :  { %387 = vmatpush1.bf16.msra.mxu0 %v956_v15  ;;  %v127_v50 = vcombine.low %v71_v35, %v87_v42  ;;  %v128_v51 = vcombine.high %v71_v35, %v87_v42  ;;  %v143_v52 = vcombine.low %v78_v40, %v94_v44  ;;  %v144_v53 = vcombine.high %v78_v40, %v94_v44 }
  0x36   :  { %913 = vmatpush3.bf16.msra.mxu1 %v955_v11  ;;  %388 = vmatprep.subr.bf16.mxu0 %v957_v16  ;;  %v159_v54 = vcombine.low %v103_v43, %v119_v47  ;;  %v160_v55 = vcombine.high %v103_v43, %v119_v47  ;;  %v175_v56 = vcombine.low %v110_v48, %v126_v49  ;;  %v1067_v16 = vmov 1966171168  }
  0x37   :  { %914 = vmatprep.subr.bf16.mxu1 %v959_v17  ;;  %v176_v57 = vcombine.high %v110_v48, %v126_v49  ;;  %v135_v59 = vrot.slane %v127_v50, %v1134_v39  ;;  %v142_v60 = vrot.slane %v128_v51, %v1134_v39  ;;  %v151_v61 = vrot.slane %v143_v52, %v1134_v39 }
  0x38   :  { %v167_v62 = vrot.slane %v159_v54, %v1134_v39  ;;  %v174_v63 = vrot.slane %v160_v55, %v1134_v39  ;;  %v183_v1 = vrot.slane %v175_v56, %v1134_v39  ;;  %v158_v2 = vrot.slane %v144_v53, %v1134_v39 }
  0x39   :  { %389 = vmatpush1.bf16.msra.mxu0 %v960_v19  ;;  %v190_v9 = vrot.slane %v176_v57, %v1134_v39 }
  0x3a   :  { %915 = vmatpush3.bf16.msra.mxu1 %v959_v17  ;;  %390 = vmatprep.subr.bf16.mxu0 %v961_v23  ;;  %v191_v3 = vcombine.low %v135_v59, %v167_v62  ;;  %v192_v4 = vcombine.high %v135_v59, %v167_v62  ;;  %v193_v5 = vcombine.low %v142_v60, %v174_v63  ;;  %v596_v17 = vunpack.c.l.s4 %v1067_v16 }
  0x3b   :  { %916 = vmatprep.subr.bf16.mxu1 %v963_v24  ;;  %v194_v6 = vcombine.high %v142_v60, %v174_v63  ;;  %v195_v7 = vcombine.low %v151_v61, %v183_v1  ;;  %v196_v8 = vcombine.high %v151_v61, %v183_v1  ;;  %v197_v13 = vcombine.low %v158_v2, %v190_v9 }
  0x3c   :  { %v199_v10 = vpack.c.bf16 %v192_v4, %v191_v3  ;;  %v198_v14 = vcombine.high %v158_v2, %v190_v9  ;;  %v597_v19 = vunpack.c.0.s8 %v596_v17  ;;  %v243_v23 = vsub.s32 1, %v1127_v18 }
  0x3d   :  { %391 = vmatpush1.bf16.msra.mxu0 %v964_v25  ;;  %v200_v11 = vpack.c.bf16 %v194_v6, %v193_v5  ;;  %v201_v12 = vpack.c.bf16 %v196_v8, %v195_v7 }
  0x3e   :  { %917 = vmatpush3.bf16.msra.mxu1 %v963_v24  ;;  %392 = vmatprep.subr.bf16.mxu0 %v965_v26  ;;  %v202_v15 = vpack.c.bf16 %v198_v14, %v197_v13  ;;  %v600_v20 = vsub.s32 %v597_v19, %v1127_v18  ;;  %v549_v24 = vmul.f32 %v526_v21, %v526_v21  ;;  %v247_v26 = vsub.s32 2, %v1127_v18 }
  0x3f   :  { %918 = vmatprep.subr.bf16.mxu1 %v967_v27  ;;  %922 = vmatprep.mubr.bf16.mxu1 %v199_v10 }
  0x40   :  { %v601_v25 = vrot.slane %v592_v22, %v600_v20  ;;  %v571_v31 = vmul.f32 %v549_v24, %v549_v24 }
  0x41   :  { %393 = vmatpush1.bf16.msra.mxu0 %v968_v41  ;;  %v608_v41 = vrot.slane %v594_v29, %v600_v20 }
  0x42   :  { %919 = vmatpush3.bf16.msra.mxu1 %v967_v27  ;;  %394 = vmatprep.subr.bf16.mxu0 %v969_v45  ;;  %v1167_v27 = vsub.s32 0, %v1127_v18  ;;  %v609_v32 = vcombine.high %v601_v25, %v601_v25  ;;  %v617_v40 = vrot.slane %v601_v25, %v600_v20 }
  0x43   :  { %920 = vmatprep.subr.bf16.mxu1 %v971_v46  ;;  %v610_v56 = vcombine.high %v608_v41, %v608_v41  ;;  %v624_v4 = vrot.slane %v608_v41, %v600_v20 }
  0x44   :  { %v1174_v34 = vrot.slane %v526_v21, %v1167_v27  ;;  %v1177_v36 = vrot.slane %v549_v24, %v1167_v27  ;;  %v1181_v43 = vrot.slane %v571_v31, %v1167_v27  ;;  %v631_v45 = vrot.slane %v609_v32, %v600_v20 }
  0x45   :  { %395 = vmatpush1.bf16.msra.mxu0 %v972_v58  ;;  %v646_v54 = vrot.slane %v617_v40, %v1167_v27  ;;  %v639_v59 = vcombine.high %v617_v40, %v617_v40 }
  0x46   :  { %921 = vmatpush3.bf16.msra.mxu1 %v971_v46  ;;  %v533_v47 = vmul.f32 0.0, %v1174_v34  ;;  %v556_v50 = vmul.f32 0.0, %v1177_v36  ;;  %v1190_v57 = vmul.f32 0.0, %v1181_v43  ;;  %v650_v58 = vrot.slane %v631_v45, %v1167_v27 }
  0x47   :  { %v641_v63 = vcombine.high %v631_v45, %v631_v45  ;;  %v683_v6 = vmul.f32 0.0, %v646_v54  ;;  %v654_v19 = vrot.slane %v639_v59, %v1167_v27 }
  0x48   :  { %413 = vmatmul.mubr.bf16.vlgmr.msra.gmra.mrb[0].mxu0 %v199_v10  ;;  %v1198_v10 = vrot.slane %v610_v56, %v600_v20 }
  0x49   :  { %923 = vmatmul.mubr.bf16.vlgmr.msra.gmra.mrb[0].mxu1 %v200_v11  ;;  %422 = vmatprep.mubr.bf16.mxu0 %v1064_v0  ;;  %v658_v22 = vrot.slane %v641_v63, %v1167_v27 }
  0x4a   :  { %926 = vmatprep.mubr.bf16.mxu1 %v201_v12 }
  0x50   :  { %423 = vmatmul.mubr.bf16.gmra.mrb[4].mxu0 %v200_v11 }
  0x51   :  { %432 = vmatprep.mubr.bf16.mxu0 %v1064_v0  ;;  %927 = vmatmul.mubr.bf16.gmra.mrb[4].mxu1 %v202_v15 }
  0x58   :  { %433 = vmatmul.mubr.bf16.gmra.mrb[8].mxu0 %v201_v12  ;;  %v684_v12 = vmul.f32 0.0, %v650_v58 }
  0x59   :  { %442 = vmatprep.mubr.bf16.mxu0 %v1064_v0  ;;  %v235_v0 = vld [vmem:[%s1289_s2] sm:$0x7]  ;;  %s1068_s2 = smov [#allocation8]  }
  0x5a   :  { %v1169_v30 = vrot.slane %v235_v0, %v243_v23  ;;  %v1171_v33 = vrot.slane %v235_v0, %v247_v26  ;;  %v1195_v1 = vrot.slane %v235_v0, %v1167_v27  ;;  %v662_v0 = vrot.slane %v624_v4, %v1167_v27  ;;  %s857_s3 = sshll.u32 %s1068_s2, 4  ;;  %s858_s3 = int_to_ptr.vmem [resolvable:$true] %s857_s3 }
  0x5b   :  { %s1030_s4 = scalar_lea.vmem %s858_s3, 1024  ;;  %p1035_p3 = scmp.lt.s32.totalorder %s858_s3, %s858_s3 }
  0x5c   :  { %p1031_p2 = scmp.ne.s32.totalorder %s858_s3, %s1030_s4  ;;  %p1036_p4 = scmp.lt.s32.totalorder %s1030_s4, %s1030_s4 }
  0x5e   :  { %p1037_p5 = por %p1036_p4, %p1035_p3 }
  0x60   :  { %443 = vmatmul.mubr.bf16.gmra.mrb[12].mxu0 %v202_v15  ;;  %p1038_p6 = pnand %p1037_p5, %p1031_p2 }
 0x11b   :  { %v414_v35 = vpop.f32.mrb[0].mxu0 }
 0x11c   :  { %v924_v37 = vpop.f32.mrb[0].mxu1  ;;  %v416_v38 = vpop.f32.mrb[1].mxu0  ;;  %v415_v29 = vadd.f32 %v414_v35, %v1195_v1 }
 0x11d   :  { %v417_v18 = vadd.f32 %v416_v38, %v1169_v30  ;;  %v487_v42 = vpop.f32.mrb[1].mxu1  ;;  %v418_v44 = vpop.f32.mrb[2].mxu0  ;;  %v496_v2 = vadd.f32 %v924_v37, %v1171_v33  ;;  %v666_v37 = vrot.slane %v1198_v10, %v1167_v27 }
 0x11e   :  { %v488_v46 = vadd.f32 %v487_v42, %v1171_v33  ;;  %v925_v48 = vpop.f32.mrb[2].mxu1  ;;  %v420_v49 = vpop.f32.mrb[3].mxu0  ;;  %v419_v45 = vadd.f32 %v418_v44, %v1195_v1  ;;  %v687_v44 = vmul.f32 0.0, %v662_v0 }
 0x11f   :  { %v421_v51 = vadd.f32 %v420_v49, %v1169_v30  ;;  %v490_v52 = vpop.f32.mrb[3].mxu1  ;;  %v499_v11 = vadd.f32 %v925_v48, %v1171_v33  ;;  %v685_v49 = vmul.f32 0.0, %v654_v19  ;;  %v688_v63 = vmul.f32 0.0, %v666_v37 }
 0x120   :  { %v518_v53 = vmul.f32 %v488_v46, %v417_v18  ;;  %v491_v55 = vadd.f32 %v490_v52, %v1171_v33 }
 0x122   :  { %v534_v60 = vmul.f32 %v1174_v34, %v518_v53  ;;  %v541_v61 = vadd.f32 %v533_v47, %v518_v53  ;;  %v519_v62 = vmul.f32 %v491_v55, %v421_v51  ;;  %v640_v47 = vcombine.high %v624_v4, %v624_v4 }
 0x123   :  { %v424_v3 = vpop.f32.mrb[4].mxu0  ;;  %v686_v53 = vmul.f32 0.0, %v658_v22  ;;  %v642_v4 = vcombine.high %v1198_v10, %v1198_v10 }
 0x124   :  { %v563_v5 = vadd.f32 %v556_v50, %v541_v61  ;;  %v542_v7 = vadd.f32 %v534_v60, %v519_v62  ;;  %v426_v8 = vpop.f32.mrb[5].mxu0  ;;  %v928_v9 = vpop.f32.mrb[4].mxu1  ;;  %v535_v24 = vmul.f32 %v1174_v34, %v519_v62  ;;  %v557_v38 = vmul.f32 %v1177_v36, %v541_v61 }
 0x125   :  { %v427_v13 = vadd.f32 %v426_v8, %v1169_v30  ;;  %v428_v14 = vpop.f32.mrb[6].mxu0  ;;  %v503_v15 = vpop.f32.mrb[5].mxu1 }
 0x126   :  { %v583_v16 = vadd.f32 %v1190_v57, %v563_v5  ;;  %v564_v17 = vadd.f32 %v556_v50, %v542_v7  ;;  %v430_v21 = vpop.f32.mrb[7].mxu0  ;;  %v929_v23 = vpop.f32.mrb[6].mxu1  ;;  %v558_v48 = vmul.f32 %v1177_v36, %v542_v7  ;;  %v504_v55 = vadd.f32 %v503_v15, %v1171_v33 }
 0x127   :  { %v520_v20 = vmul.f32 %v496_v2, %v427_v13  ;;  %v431_v25 = vadd.f32 %v430_v21, %v1169_v30  ;;  %v506_v26 = vpop.f32.mrb[7].mxu1  ;;  %v670_v2 = vrot.slane %v640_v47, %v1167_v27  ;;  %v512_v15 = vadd.f32 %v928_v9, %v1171_v33 }
 0x128   :  { %v691_v31 = vadd.f32 %v683_v6, %v583_v16  ;;  %v584_v32 = vadd.f32 %v1190_v57, %v564_v17  ;;  %v507_v60 = vadd.f32 %v506_v26, %v1171_v33  ;;  %v425_v6 = vadd.f32 %v424_v3, %v1195_v1 }
 0x129   :  { %v536_v40 = vmul.f32 %v1174_v34, %v520_v20  ;;  %v543_v41 = vadd.f32 %v535_v24, %v520_v20  ;;  %v521_v18 = vmul.f32 %v499_v11, %v431_v25  ;;  %v429_v21 = vadd.f32 %v428_v14, %v1195_v1 }
 0x12a   :  { %v700_v42 = vmul.f32 %v691_v31, %v415_v29  ;;  %v692_v46 = vadd.f32 %v684_v12, %v584_v32  ;;  %v579_v12 = vmul.f32 %v1181_v43, %v563_v5  ;;  %v580_v3 = vmul.f32 %v1181_v43, %v564_v17 }
 0x12b   :  { %v1216_v35 = vadd.f32 %v557_v38, %v543_v41  ;;  %v544_v50 = vadd.f32 %v536_v40, %v521_v18  ;;  %v434_v51 = vpop.f32.mrb[8].mxu0  ;;  %v537_v13 = vmul.f32 %v1174_v34, %v521_v18  ;;  %v559_v24 = vmul.f32 %v1177_v36, %v543_v41 }
 0x12c   :  { %v701_v52 = vmul.f32 %v692_v46, %v419_v45  ;;  %v436_v54 = vpop.f32.mrb[9].mxu0  ;;  %v515_v26 = vadd.f32 %v929_v23, %v1171_v33  ;;  %v435_v31 = vadd.f32 %v434_v51, %v1195_v1 }
 0x12d   :  { %v585_v56 = vadd.f32 %v1190_v57, %v1216_v35  ;;  %v1221_v58 = vadd.f32 %v558_v48, %v544_v50  ;;  %v438_v59 = vpop.f32.mrb[10].mxu0  ;;  %v437_v61 = vadd.f32 %v436_v54, %v1169_v30  ;;  %v560_v9 = vmul.f32 %v1177_v36, %v544_v50 }
 0x12e   :  { %v440_v62 = vpop.f32.mrb[11].mxu0  ;;  %v439_v40 = vadd.f32 %v438_v59, %v1195_v1 }
 0x12f   :  { %v693_v7 = vadd.f32 %v685_v49, %v585_v56  ;;  %v586_v8 = vadd.f32 %v1190_v57, %v1221_v58  ;;  %v441_v11 = vadd.f32 %v440_v62, %v1169_v30  ;;  %v522_v16 = vmul.f32 %v504_v55, %v437_v61 }
 0x131   :  { %v702_v19 = vmul.f32 %v693_v7, %v425_v6  ;;  %v694_v22 = vadd.f32 %v686_v53, %v586_v8  ;;  %v523_v10 = vmul.f32 %v507_v60, %v441_v11  ;;  %v538_v57 = vmul.f32 %v1174_v34, %v522_v16 }
 0x132   :  { %v545_v20 = vadd.f32 %v537_v13, %v522_v16  ;;  %v689_v8 = vmul.f32 0.0, %v670_v2  ;;  %v674_v11 = vrot.slane %v642_v4, %v1167_v27 }
 0x133   :  { %v708_v25 = vcombine.low %v700_v42, %v702_v19  ;;  %v709_v0 = vcombine.high %v700_v42, %v702_v19  ;;  %v703_v5 = vmul.f32 %v694_v22, %v429_v21  ;;  %v444_v29 = vpop.f32.mrb[12].mxu0  ;;  %v546_v32 = vadd.f32 %v538_v57, %v523_v10 }
 0x134   :  { %v567_v14 = vadd.f32 %v559_v24, %v545_v20  ;;  %v446_v37 = vpop.f32.mrb[13].mxu0  ;;  %v539_v41 = vmul.f32 %v1174_v34, %v523_v10  ;;  %v561_v42 = vmul.f32 %v1177_v36, %v545_v20  ;;  %v690_v21 = vmul.f32 0.0, %v674_v11 }
 0x135   :  { %v724_v38 = vcombine.low %v701_v52, %v703_v5  ;;  %v725_v17 = vcombine.high %v701_v52, %v703_v5  ;;  %v448_v18 = vpop.f32.mrb[14].mxu0  ;;  %v568_v46 = vadd.f32 %v560_v9, %v546_v32  ;;  %v447_v33 = vadd.f32 %v446_v37, %v1169_v30 }
 0x136   :  { %v587_v45 = vadd.f32 %v579_v12, %v567_v14  ;;  %v450_v23 = vpop.f32.mrb[15].mxu0  ;;  %v716_v47 = vrot.slane %v708_v25, %v1130_v28  ;;  %v723_v48 = vrot.slane %v709_v0, %v1130_v28  ;;  %v581_v12 = vmul.f32 %v1181_v43, %v1216_v35 }
 0x137   :  { %v732_v49 = vrot.slane %v724_v38, %v1130_v28  ;;  %v739_v50 = vrot.slane %v725_v17, %v1130_v28  ;;  %v588_v52 = vadd.f32 %v580_v3, %v568_v46  ;;  %v524_v53 = vmul.f32 %v512_v15, %v447_v33 }
 0x138   :  { %v695_v51 = vadd.f32 %v687_v44, %v587_v45  ;;  %v451_v54 = vadd.f32 %v450_v23, %v1169_v30  ;;  %v562_v30 = vmul.f32 %v1177_v36, %v546_v32  ;;  %v449_v35 = vadd.f32 %v448_v18, %v1195_v1 }
 0x139   :  { %v772_v55 = vcombine.low %v716_v47, %v732_v49  ;;  %v773_v56 = vcombine.high %v716_v47, %v732_v49  ;;  %v788_v59 = vcombine.low %v723_v48, %v739_v50  ;;  %v789_v60 = vcombine.high %v723_v48, %v739_v50 }
 0x13a   :  { %v704_v61 = vmul.f32 %v695_v51, %v435_v31  ;;  %v696_v62 = vadd.f32 %v688_v63, %v588_v52  ;;  %v540_v6 = vmul.f32 %v1174_v34, %v524_v53  ;;  %v547_v7 = vadd.f32 %v539_v41, %v524_v53 }
 0x13b   :  { %v525_v15 = vmul.f32 %v515_v26, %v451_v54  ;;  %v582_v63 = vmul.f32 %v1181_v43, %v1221_v58  ;;  %v445_v34 = vadd.f32 %v444_v29, %v1195_v1  ;;  %v780_v31 = vrot.slane %v772_v55, %v1134_v39 }
 0x13c   :  { %v705_v44 = vmul.f32 %v696_v62, %v439_v40  ;;  %v569_v13 = vadd.f32 %v561_v42, %v547_v7  ;;  %v787_v1 = vrot.slane %v773_v56, %v1134_v39  ;;  %v803_v17 = vrot.slane %v789_v60, %v1134_v39 }
 0x13d   :  { %v548_v19 = vadd.f32 %v540_v6, %v525_v15 }
 0x13e   :  { %v589_v16 = vadd.f32 %v581_v12, %v569_v13 }
 0x13f   :  { %v570_v2 = vadd.f32 %v562_v30, %v548_v19 }
 0x140   :  { %v697_v22 = vadd.f32 %v689_v8, %v589_v16 }
 0x141   :  { %v590_v27 = vadd.f32 %v582_v63, %v570_v2 }
 0x142   :  { %v706_v10 = vmul.f32 %v697_v22, %v445_v34 }
 0x143   :  { %v698_v24 = vadd.f32 %v690_v21, %v590_v27 }
 0x144   :  { %v740_v4 = vcombine.low %v704_v61, %v706_v10  ;;  %v741_v3 = vcombine.high %v704_v61, %v706_v10 }
 0x145   :  { %v707_v57 = vmul.f32 %v698_v24, %v449_v35 }
 0x146   :  { %v748_v25 = vrot.slane %v740_v4, %v1130_v28  ;;  %v755_v0 = vrot.slane %v741_v3, %v1130_v28 }
 0x147   :  { %v756_v20 = vcombine.low %v705_v44, %v707_v57  ;;  %v757_v36 = vcombine.high %v705_v44, %v707_v57 }
 0x149   :  { %v764_v43 = vrot.slane %v756_v20, %v1130_v28  ;;  %v771_v58 = vrot.slane %v757_v36, %v1130_v28  ;;  %v796_v28 = vrot.slane %v788_v59, %v1134_v39 }
 0x14b   :  { %v804_v5 = vcombine.low %v748_v25, %v764_v43  ;;  %v805_v26 = vcombine.high %v748_v25, %v764_v43  ;;  %v820_v29 = vcombine.low %v755_v0, %v771_v58  ;;  %v821_v9 = vcombine.high %v755_v0, %v771_v58 }
 0x14d   :  { %v812_v14 = vrot.slane %v804_v5, %v1134_v39  ;;  %v819_v32 = vrot.slane %v805_v26, %v1134_v39  ;;  %v828_v37 = vrot.slane %v820_v29, %v1134_v39  ;;  %v835_v38 = vrot.slane %v821_v9, %v1134_v39 }
 0x14f   :  { %v836_v40 = vcombine.low %v780_v31, %v812_v14  ;;  %v837_v41 = vcombine.high %v780_v31, %v812_v14  ;;  %v838_v18 = vcombine.low %v787_v1, %v819_v32  ;;  %v839_v42 = vcombine.high %v787_v1, %v819_v32 }
 0x150   :  { %v840_v45 = vcombine.low %v796_v28, %v828_v37  ;;  %v841_v46 = vcombine.high %v796_v28, %v828_v37  ;;  %v842_v33 = vcombine.low %v803_v17, %v835_v38  ;;  %v843_v23 = vcombine.high %v803_v17, %v835_v38 }
 0x151   :  { %844 = vst [vmem:[#allocation8] sm:$0xff] %v836_v40  ;;  %845 = vst [vmem:[#allocation8 + $0x8] sm:$0xff] %v837_v41 }
 0x152   :  { %846 = vst [vmem:[#allocation8 + $0x10] sm:$0xff] %v838_v18  ;;  %847 = vst [vmem:[#allocation8 + $0x18] sm:$0xff] %v839_v42 }
 0x153   :  { %848 = vst [vmem:[#allocation8 + $0x20] sm:$0xff] %v840_v45  ;;  %849 = vst [vmem:[#allocation8 + $0x28] sm:$0xff] %v841_v46 }
 0x154   :  { %850 = vst [vmem:[#allocation8 + $0x30] sm:$0xff] %v842_v33  ;;  %851 = vst [vmem:[#allocation8 + $0x38] sm:$0xff] %v843_v23 }
 0x155   :  { %1041 = shalt.err (!%p1038_p6)
}
 0x156   :  { %s1042_s27 = scalar_lea.hbm %s1292_s5, 1024 }
 0x157   :  { %p1043_p7 = scmp.ne.s32.totalorder %s1292_s5, %s1042_s27  ;;  %p1046_p8 = scmp.lt.u32.totalorder %s1042_s27, %s1292_s5 }
 0x159   :  { %p1048_p9 = pnand %p1046_p8, %p1043_p7 }
 0x15b   :  { %1051 = shalt.err (!%p1048_p9)
}
 0x15c   :  { %863 = dma.vmem_to_hbm [thread:$0]  %s858_s3, 1024, %s1292_s5, [#allocation5], %s1059_s28, %s1059_s28, %s1060_s29  }
 0x15d   :  { %1056 = dma.done.wait [#allocation5], 1024  }
 0x15e   :  { %1057 = vsyncadd [#allocation5], 4294966272 }
 0x15f   :  { %867 = vsyncpa [#allocation4], 1 }
 0x160   :  { %868 = vsyncpa [#allocation7], 1 }
 0x161   :  { %869 = vsyncpa [#allocation5], 1 }

</bundles_post_ra>
